<compile_context>
chip_gen: v7x
topology: tpu7x:2x2x1
jax: 0.10.0
libtpu: 0.0.40
codegen_flags: <defaults>
</compile_context>

<pallas_src>
import jax
import jax.numpy as jnp
from jax.experimental import pallas as pl
from jax.experimental.pallas import tpu as pltpu


def _scaler_reverse_kernel(x_ref, p_ref, o_ref):
    # out = x * std + mean, computed in f32, cast on the store.
    #   x_ref: (tile_r, tile_t)
    #   p_ref: (tile_r, 2) float32, [:, 0] = std, [:, 1] = mean
    x = x_ref[...].astype(jnp.float32)
    std = p_ref[:, 0:1]   # (tile_r, 1) broadcasts across lanes (time)
    mean = p_ref[:, 1:2]
    o_ref[...] = (x * std + mean).astype(o_ref.dtype)


def _chip_tuning():
    """Return (target_block_bytes, is_megacore) for the attached TPU."""
    try:
        kind = jax.devices()[0].device_kind.lower()
    except Exception:
        kind = ""
    if "v5" in kind:
        # v5e: 16 MiB default scoped-VMEM limit; 2 MiB blocks already amortize
        # step overhead to <7% at ~0.8 TB/s.
        return 2 * 1024 * 1024, False
    if "v7" in kind or "7x" in kind:
        # v7x: 64 MiB physical VMEM / 32 MiB default scoped limit, 2 TCs.
        return 4 * 1024 * 1024, True
    if "v6" in kind:
        # v6e: 32 MiB default scoped limit.
        return 4 * 1024 * 1024, False
    # Unknown / older chip: conservative.
    return 2 * 1024 * 1024, False


def _choose_tiles(rows, T, elem_bytes):
    """Jointly size (tile_r, tile_t) to hit the per-chip block-byte target."""
    target_block_bytes, is_megacore = _chip_tuning()

    # Row tile: deepclean has rows = B*C tiny, so usually the full row extent
    # (a full-dim block is always legal).  1024 is a multiple of every sublane
    # packing granularity (8 / 16 / 32), so the >1024 path is always aligned.
    tile_r = rows if rows <= 1024 else 1024
    n_row_blocks = pl.cdiv(rows, tile_r)

    # Time tile: grow (in 128-lane units) until the x block reaches the byte
    # target, then balance the block count so the trailing block is not mostly
    # masked (e.g. T = 2176 -> 2 blocks of 1152, not 2048 + 128).
    lanes = pl.cdiv(T, 128)
    target_lanes = max(1, target_block_bytes // (tile_r * elem_bytes * 128))
    n_t_blocks = max(1, pl.cdiv(lanes, target_lanes))

    # v7x megacore: guarantee >= 2 (and prefer an even number of) blocks along
    # a "parallel" axis so both TensorCores get work.
    total_bytes = rows * T * elem_bytes
    if is_megacore and n_row_blocks == 1 and total_bytes > 4 * 1024 * 1024:
        if n_t_blocks < 2:
            n_t_blocks = 2
        elif n_t_blocks % 2:
            n_t_blocks += 1

    tile_t_lanes = pl.cdiv(lanes, n_t_blocks)
    tile_t = min(T, tile_t_lanes * 128)
    # If tile_t == T (even with T % 128 != 0) it is a full-dim block and always
    # legal; otherwise tile_t is a multiple of 128 and only the edge block is
    # masked (lane-dense stores everywhere else).
    return tile_r, tile_t


def postprocess(x, mean, std, *, donate_x=False):
    """Reverse channel-wise standardization: x * std[c] + mean[c].

    x:    (B, C, T)
    mean: (C,)
    std:  (C,)
    donate_x: alias the output onto x's buffer (caller must donate x).
    """
    B, C, T = x.shape
    rows = B * C
    elem_bytes = jnp.dtype(x.dtype).itemsize
    tile_r, tile_t = _choose_tiles(rows, T, elem_bytes)

    # Flatten batch/channel into rows (row index = b * C + c).
    x2 = x.reshape(rows, T)

    # Pack (std, mean) into one f32 (rows, 2) array: a single small param DMA
    # per row tile, and the affine stays in f32 regardless of x's dtype.
    params = jnp.stack(
        [std.astype(jnp.float32), mean.astype(jnp.float32)], axis=-1)  # (C, 2)
    params_rows = jnp.tile(params, (B, 1))                             # (rows, 2)

    grid = (pl.cdiv(rows, tile_r), pl.cdiv(T, tile_t))

    cost = pl.CostEstimate(
        flops=2 * rows * T,
        transcendentals=0,
        bytes_accessed=2 * rows * T * elem_bytes + rows * 2 * 4,
    )

    out = pl.pallas_call(
        _scaler_reverse_kernel,
        out_shape=jax.ShapeDtypeStruct((rows, T), x.dtype),
        grid=grid,
        in_specs=[
            # x: row tile x time tile.
            pl.BlockSpec((tile_r, tile_t), lambda i, j: (i, j)),
            # params: block index depends only on the outer row axis, so the
            # pipeline skips their DMA across the inner time loop.
            pl.BlockSpec((tile_r, 2), lambda i, j: (i, 0)),
        ],
        out_specs=pl.BlockSpec((tile_r, tile_t), lambda i, j: (i, j)),
        compiler_params=pltpu.CompilerParams(
            dimension_semantics=("parallel", "parallel"),
        ),
        cost_estimate=cost,
        input_output_aliases={0: 0} if donate_x else {},
    )(x2, params_rows)

    return out.reshape(B, C, T)


if __name__ == "__main__":
    key = jax.random.PRNGKey(0)
    jitted = jax.jit(postprocess)

    # Small shapes consistent with the module: batch=2, channels=4.
    for T in (128, 200):  # 200 exercises the non-128-multiple (full-dim) path
        B, C = 2, 4
        kx, key = jax.random.split(key)
        x = jax.random.normal(kx, (B, C, T), dtype=jnp.float32)

        # Deterministic "fitted" scaler parameters (ChannelWiseScaler buffers:
        # mean, std of shape (num_channels,)).
        mean = jnp.arange(C, dtype=jnp.float32) * 0.5          # [0.0, 0.5, 1.0, 1.5]
        std = 1.0 + 0.25 * jnp.arange(C, dtype=jnp.float32)    # [1.0, 1.25, 1.5, 1.75]

        # Pure-JAX reference of scaler(X, reverse=True).
        ref = x * std[None, :, None] + mean[None, :, None]

        out = jax.block_until_ready(jitted(x, mean, std))

        assert out.shape == (B, C, T)
        assert out.dtype == x.dtype
        assert jnp.allclose(out, ref, atol=1e-6, rtol=1e-6)

    print("KERNEL_OK")
</pallas_src>

<mosaic_0001>
module attributes {stable_mosaic.version = 11 : i64} {
  func.func @_scaler_reverse_kernel(%arg0: i32, %arg1: i32, %arg2: memref<8x128xf32, #tpu.memory_space<vmem>>, %arg3: memref<8x2xf32, #tpu.memory_space<vmem>>, %arg4: memref<8x128xf32, #tpu.memory_space<vmem>>) attributes {dimension_semantics = [#tpu.dimension_semantics<parallel>, #tpu.dimension_semantics<parallel>], iteration_bounds = array<i64: 1, 1>, scalar_prefetch = 0 : i64, scratch_operands = 0 : i64, tpu.core_type = #tpu.core_type<tc>, window_params = [{transform_indices = @transform_0, window_bounds = array<i64: 8, 128>}, {transform_indices = @transform_1, window_bounds = array<i64: 8, 2>}, {transform_indices = @transform_2, window_bounds = array<i64: 8, 128>}]} {
    %c0 = arith.constant 0 : index
    %c0_0 = arith.constant 0 : index
    %0 = vector.load %arg2[%c0, %c0_0] : memref<8x128xf32, #tpu.memory_space<vmem>>, vector<8x128xf32>
    %c0_1 = arith.constant 0 : index
    %c0_2 = arith.constant 0 : index
    %1 = vector.load %arg3[%c0_1, %c0_2] : memref<8x2xf32, #tpu.memory_space<vmem>>, vector<8x1xf32>
    %c0_3 = arith.constant 0 : index
    %c1 = arith.constant 1 : index
    %2 = vector.load %arg3[%c0_3, %c1] : memref<8x2xf32, #tpu.memory_space<vmem>>, vector<8x1xf32>
    %3 = vector.broadcast %1 : vector<8x1xf32> to vector<8x128xf32>
    %4 = arith.mulf %0, %3 : vector<8x128xf32>
    %5 = vector.broadcast %2 : vector<8x1xf32> to vector<8x128xf32>
    %6 = arith.addf %4, %5 : vector<8x128xf32>
    %c0_4 = arith.constant 0 : index
    %c0_5 = arith.constant 0 : index
    %7 = vector.load %arg4[%c0_4, %c0_5] : memref<8x128xf32, #tpu.memory_space<vmem>>, vector<8x128xf32>
    tpu.vector_store %arg4[%c0_4, %c0_5], %6 {strides = array<i32>} : memref<8x128xf32, #tpu.memory_space<vmem>>, vector<8x128xf32>,
    return
  }
  func.func @transform_0(%arg0: i32, %arg1: i32) -> (i32, i32) {
    %c0_i32 = arith.constant 0 : i32
    return %arg0, %arg1 : i32, i32
  }
  func.func @transform_1(%arg0: i32, %arg1: i32) -> (i32, i32) {
    %c0_i32 = arith.constant 0 : i32
    %c0_i32_0 = arith.constant 0 : i32
    return %arg0, %c0_i32 : i32, i32
  }
  func.func @transform_2(%arg0: i32, %arg1: i32) -> (i32, i32) {
    %c0_i32 = arith.constant 0 : i32
    return %arg0, %arg1 : i32, i32
  }
}

</mosaic_0001>

<bundles_post_ra>
// kernel: postprocess.1
= control target key start
LH: loop header
LB: loop body
LE: loop exit
PB: predicated region body
PF: predicated region fallthrough
CT: control target
= control target key end

     0   :  { %s105_s0 = inlined_call_operand.vmem [shape: f32[8,128], index: 0, kind: input, shape index: {}]   ;;  %s106_s1 = inlined_call_operand.vmem [shape: f32[8,2], index: 1, kind: input, shape index: {}]   ;;  %s107_s2 = inlined_call_operand.hbm [shape: f32[8,128], index: 2, kind: output, shape index: {}]  }
   0x1   :  { %v13_v0 = vld [vmem:[%s106_s1] sm:$0xff] }
   0x2   :  { %7 = vsyncpa [#allocation3], 0  ;;  %v69_v1 = vmov 0   ;;  %v70_v2 = vmov 1   ;;  %v12_v4 = vld [vmem:[%s105_s0] sm:$0xff]  ;;  %s71_s13 = smov [#allocation2]  }
   0x3   :  { %43 = vset.pattern.permute.xlu0 %v69_v1  ;;  %s32_s14 = sshll.u32 %s71_s13, 4  ;;  %s33_s14 = int_to_ptr.vmem [resolvable:$true] %s32_s14 }
   0x4   :  { %16 = vperm.xlu0 %43, %v13_v0   ;;  %s45_s1 = scalar_lea.vmem %s33_s14, 128  ;;  %p50_p1 = scmp.lt.s32.totalorder %s33_s14, %s33_s14 }
   0x5   :  { %p46_p0 = scmp.ne.s32.totalorder %s33_s14, %s45_s1  ;;  %p51_p2 = scmp.lt.s32.totalorder %s45_s1, %s45_s1 }
   0x7   :  { %p52_p3 = por %p51_p2, %p50_p1 }
   0x8   :  { %44 = vset.pattern.permute.xlu0 %v70_v2 }
   0x9   :  { %21 = vperm.xlu0 %44, %v13_v0   ;;  %p53_p4 = pnand %p52_p3, %p46_p0 }
  0x83   :  { %v17_v3 = vpop.permute.xlu0 %16 }
  0x84   :  { %v19_v5 = vmul.f32 %v17_v3, %v12_v4 }
  0x88   :  { %v22_v6 = vpop.permute.xlu0 %21 }
  0x89   :  { %v24_v7 = vadd.f32 %v22_v6, %v19_v5 }
  0x8b   :  { %25 = vst [vmem:[#allocation2] sm:$0xff] %v24_v7 }
  0x8c   :  { %56 = shalt.err (!%p53_p4)
}
  0x8d   :  { %s57_s17 = scalar_lea.hbm %s107_s2, 128 }
  0x8e   :  { %p58_p5 = scmp.ne.s32.totalorder %s107_s2, %s57_s17  ;;  %p61_p6 = scmp.lt.u32.totalorder %s57_s17, %s107_s2 }
  0x90   :  { %p63_p7 = pnand %p61_p6, %p58_p5 }
  0x92   :  { %66 = shalt.err (!%p63_p7)
}
  0x93   :  { %35 = dma.vmem_to_hbm [thread:$0]  %s33_s14, 128, %s107_s2, [#allocation3]  }
  0x94   :  { %67 = dma.done.wait [#allocation3], 128  }
  0x95   :  { %68 = vsyncadd [#allocation3], 4294967168 }
  0x96   :  { %39 = vsyncpa [#allocation3], 1 }

</bundles_post_ra>
